<compile_context>
chip_gen: v5e
topology: v5e:2x2
jax: 0.10.0
libtpu: 0.0.40
codegen_flags: <defaults>
</compile_context>

<pallas_src>
import functools
import math

import jax
import jax.numpy as jnp
from jax.experimental import pallas as pl
from jax.experimental.pallas import tpu as pltpu

_BLOCK_BYTES = 4 * 1024 * 1024          # per-buffer tile budget (~4 MiB)
_VMEM_LIMIT = 48 * 1024 * 1024          # explicit scoped-VMEM request (v7x-safe)


def _compiler_params(semantics):
    return pltpu.CompilerParams(dimension_semantics=semantics,
                                vmem_limit_bytes=_VMEM_LIMIT)


# ----------------------------------------------------------------------------
# Static tiling helpers (pure Python ints)
# ----------------------------------------------------------------------------

def _sublane_pack(itemsize):
    """Native sublane packing: 8 for f32, 16 for bf16, 32 for int8/fp8."""
    return max(8, 32 // max(1, itemsize))


def _elementwise_2d_shape(shape):
    """Flatten to (rows, cols) with cols = product of trailing dims, lane-dense
    (>=128) when possible.  Pure reshape: flat order is preserved."""
    if len(shape) == 0:
        return 1, 1
    cols = shape[-1]
    j = len(shape) - 1
    while j > 0 and cols < 128:
        j -= 1
        cols *= shape[j]
    rows = math.prod(shape) // cols
    return rows, cols


def _tile_2d(rows, cols, itemsize):
    """Row+lane tile for elementwise kernels, bounded to _BLOCK_BYTES."""
    sp = _sublane_pack(itemsize)
    max_lane = max(128, _BLOCK_BYTES // (sp * itemsize))
    tc = cols if cols <= max_lane else (max_lane // 128) * 128
    max_rows = max(sp, _BLOCK_BYTES // max(1, tc * itemsize))
    tr = rows if rows <= max_rows else (max_rows // sp) * sp
    return tr, tc


def _rowtile_full_lane(rows, cols, itemsize, budget=_BLOCK_BYTES):
    """Row tile (multiple of the sublane pack, or full) with the full lane axis
    per block.  NOTE: for pathologically huge `cols` a single block can exceed
    the budget (see TODO at top about an online-softmax fallback)."""
    sp = _sublane_pack(itemsize)
    row_bytes = max(1, cols * itemsize)
    max_rows = max(sp, budget // row_bytes)
    if rows <= max_rows:
        return rows
    return (max_rows // sp) * sp


def _lanetile_full_sublane(d, post, itemsize):
    """Lane tile (multiple of 128 or full) with the full sublane axis d,
    accounting for sublane padding of d and the in-kernel f32 upcast."""
    sp = _sublane_pack(itemsize)
    d_pad = -(-d // sp) * sp
    col_bytes = max(1, d_pad * max(itemsize, 4))
    max_lanes = max(128, _BLOCK_BYTES // col_bytes)
    if post <= max_lanes:
        return post
    return (max_lanes // 128) * 128


def _sublane_tp(pre, d, tl, itemsize):
    """`pre` tile for the sublane-reduction path, sized against the padded,
    f32-upcast VMEM footprint (not the nominal HBM block bytes)."""
    sp = _sublane_pack(itemsize)
    d_pad = -(-d // sp) * sp
    bytes_per_pre = max(1, d_pad * tl * max(itemsize, 4))
    return max(1, min(pre, _BLOCK_BYTES // bytes_per_pre))


def _pack_factor(rows, d):
    """Largest G <= 128//d that divides rows (lane-dense packing of G
    reduction-rows per 128-lane row).  Returns 1 when packing doesn't help."""
    if d >= 128 or d <= 0:
        return 1
    gmax = min(rows, max(1, 128 // d))
    for g in range(gmax, 0, -1):
        if rows % g == 0:
            return g
    return 1


# ----------------------------------------------------------------------------
# Kernels
# ----------------------------------------------------------------------------

def _elementwise_kernel(x_ref, o_ref, *, mode, cmin, cmax):
    # NOTE(v5e): no bf16 VPU/EUP there — sigmoid of bf16 upcasts to f32
    # internally; the tile budget / VMEM limit leaves headroom for that.
    x = x_ref[...]
    if mode == "sigmoid":
        y = jax.nn.sigmoid(x)
    elif mode == "clamped_sigmoid":
        y = jnp.clip(jax.nn.sigmoid(x), cmin, cmax)
    else:                               # identity (normally short-circuited)
        y = x
    o_ref[...] = y.astype(o_ref.dtype)


def _finish_softmax(shifted, e, s, log, out_dtype):
    if log:
        return (shifted - jnp.log(s)).astype(out_dtype)
    r = pl.reciprocal(s, approx=True)   # EUP slot, essentially free
    r = r * (2.0 - s * r)               # one Newton step -> ~f32 accuracy
    return (e * r).astype(out_dtype)


def _softmax_lane_kernel(x_ref, o_ref, *, log):
    # reduction over the last (lane) axis
    x = x_ref[...].astype(jnp.float32)          # (TR, D)
    m = jnp.max(x, axis=-1, keepdims=True)
    shifted = x - m
    e = jnp.exp(shifted)
    s = jnp.sum(e, axis=-1, keepdims=True)
    o_ref[...] = _finish_softmax(shifted, e, s, log, o_ref.dtype)


def _softmax_lane_packed_kernel(x_ref, o_ref, *, log, g, d):
    # G reduction-rows packed per lane row: DMA is lane-dense; the segmented
    # reduce uses an in-kernel reshape (on-chip relayout only).
    x = x_ref[...].astype(jnp.float32)          # (TR, G*D)
    tr = x.shape[0]
    xs = x.reshape(tr, g, d)
    m = jnp.max(xs, axis=-1, keepdims=True)
    shifted = xs - m
    e = jnp.exp(shifted)
    s = jnp.sum(e, axis=-1, keepdims=True)
    y = _finish_softmax(shifted, e, s, log, o_ref.dtype)
    o_ref[...] = y.reshape(tr, g * d)


def _softmax_sublane_kernel(x_ref, o_ref, *, log):
    # reduction over the sublane axis (-2); lanes stay dense (spatial axis)
    x = x_ref[...].astype(jnp.float32)          # (TP, D, TL)
    m = jnp.max(x, axis=-2, keepdims=True)
    shifted = x - m
    e = jnp.exp(shifted)
    s = jnp.sum(e, axis=-2, keepdims=True)
    o_ref[...] = _finish_softmax(shifted, e, s, log, o_ref.dtype)


def _argmax_lane_kernel(x_ref, o_ref):
    # argmax over last axis; ties -> first index.
    # TODO(synk): NaN rows return INT32_MAX (torch returns the NaN position).
    # TODO(synk): width-1 output column (masked stores); lane-dense output via
    #             an in-kernel sublane->lane transpose is a follow-up.
    x = x_ref[...]                              # (TR, D)
    col = jax.lax.broadcasted_iota(jnp.int32, x.shape, 1)
    m = jnp.max(x, axis=-1, keepdims=True)
    big = jnp.iinfo(jnp.int32).max
    cand = jnp.where(x == m, col, big)
    o_ref[...] = jnp.min(cand, axis=-1, keepdims=True)


def _argmax_lane_packed_kernel(x_ref, o_ref, *, g, d):
    # Lane-dense packed variant of the above (small D).
    x = x_ref[...]                              # (TR, G*D)
    tr = x.shape[0]
    xs = x.reshape(tr, g, d)
    col = jax.lax.broadcasted_iota(jnp.int32, xs.shape, 2)
    m = jnp.max(xs, axis=-1, keepdims=True)
    big = jnp.iinfo(jnp.int32).max
    cand = jnp.where(xs == m, col, big)
    o_ref[...] = jnp.min(cand, axis=-1)         # (TR, G)


def _argmax_sublane_kernel(x_ref, o_ref):
    # argmax over the sublane axis (-2); ties -> first index; lane-dense out.
    x = x_ref[...]                              # (TP, D, TL)
    idx = jax.lax.broadcasted_iota(jnp.int32, x.shape, x.ndim - 2)
    m = jnp.max(x, axis=-2, keepdims=True)
    big = jnp.iinfo(jnp.int32).max
    cand = jnp.where(x == m, idx, big)
    o_ref[...] = jnp.min(cand, axis=-2, keepdims=True)   # (TP, 1, TL)


def _argmax_partial_kernel(x_ref, vals_ref, idxs_ref, *, total_rows):
    # Phase 1 of the global argmax: per-tile (max value, flat index).  Fully
    # parallel over tiles (core-splittable); writes lane-dense partial blocks.
    # Ties -> first flat index.  Padded boundary rows sit AFTER all real rows,
    # so masking them to -inf is enough (their flat index can never win a tie).
    i = pl.program_id(0)
    x = x_ref[...].astype(jnp.float32)          # (TR, C)
    r, c = x.shape
    row0 = i * r
    row_ids = jax.lax.broadcasted_iota(jnp.int32, (r, c), 0) + row0
    col_ids = jax.lax.broadcasted_iota(jnp.int32, (r, c), 1)
    xm = jnp.where(row_ids < total_rows, x, jnp.full_like(x, -jnp.inf))

    m = jnp.max(jnp.max(xm, axis=-1, keepdims=True), axis=0, keepdims=True)   # (1,1)
    big = jnp.iinfo(jnp.int32).max
    flat = row_ids * c + col_ids
    cand = jnp.where(xm == m, flat, big)
    idx = jnp.min(jnp.min(cand, axis=-1, keepdims=True), axis=0, keepdims=True)  # (1,1)

    # Broadcast the scalar partials over the whole (8,128) block: duplicates
    # are harmless for the combine (max/min are idempotent over duplicates).
    vals_ref[...] = jnp.broadcast_to(m, vals_ref.shape)
    idxs_ref[...] = jnp.broadcast_to(idx, idxs_ref.shape)


def _argmax_combine_kernel(vals_ref, idxs_ref, o_ref):
    # Phase 2: combine the tiny per-tile partial buffers.
    v = vals_ref[...]                            # (8*G, 128)
    ii = idxs_ref[...]
    m = jnp.max(jnp.max(v, axis=-1, keepdims=True), axis=0, keepdims=True)
    big = jnp.iinfo(jnp.int32).max
    cand = jnp.where(v == m, ii, big)
    o_ref[...] = jnp.min(jnp.min(cand, axis=-1, keepdims=True), axis=0, keepdims=True)


# ----------------------------------------------------------------------------
# pallas_call wrappers
# ----------------------------------------------------------------------------

def _elementwise_call(x, mode, cmin=0.0, cmax=0.0):
    orig_shape = x.shape
    rows, cols = _elementwise_2d_shape(orig_shape)
    x2 = x.reshape(rows, cols)
    itemsize = x.dtype.itemsize
    tr, tc = _tile_2d(rows, cols, itemsize)
    kern = functools.partial(_elementwise_kernel, mode=mode, cmin=cmin, cmax=cmax)
    y = pl.pallas_call(
        kern,
        out_shape=jax.ShapeDtypeStruct((rows, cols), x.dtype),
        grid=(pl.cdiv(rows, tr), pl.cdiv(cols, tc)),
        in_specs=[pl.BlockSpec((tr, tc), lambda i, j: (i, j))],
        out_specs=pl.BlockSpec((tr, tc), lambda i, j: (i, j)),
        compiler_params=_compiler_params(("parallel", "parallel")),
    )(x2)
    return y.reshape(orig_shape)


def _split_dims(shape, dim):
    pre = math.prod(shape[:dim])
    d = shape[dim]
    post = math.prod(shape[dim + 1:])
    return pre, d, post


def _softmax_call(x, dim, log):
    orig_shape = x.shape
    nd = max(x.ndim, 1)
    dim = dim % nd
    if x.ndim == 0:
        x = x.reshape(1)
    pre, d, post = _split_dims(x.shape, dim)
    itemsize = x.dtype.itemsize

    if post == 1:
        # reduction axis is (effectively) the last axis -> lane reduction
        rows, cols = pre, d
        x2 = x.reshape(rows, cols)
        g = _pack_factor(rows, cols)
        if g > 1:
            # Lane-dense packed path for small D: pure flat reshape in the
            # wrapper -> large contiguous DMAs and full 128-wide vregs.
            try:
                xp = x2.reshape(rows // g, g * cols)
                trp = _rowtile_full_lane(rows // g, g * cols, itemsize)
                kern = functools.partial(_softmax_lane_packed_kernel,
                                         log=log, g=g, d=cols)
                y = pl.pallas_call(
                    kern,
                    out_shape=jax.ShapeDtypeStruct((rows // g, g * cols), x.dtype),
                    grid=(pl.cdiv(rows // g, trp),),
                    in_specs=[pl.BlockSpec((trp, g * cols), lambda i: (i, 0))],
                    out_specs=pl.BlockSpec((trp, g * cols), lambda i: (i, 0)),
                    compiler_params=_compiler_params(("parallel",)),
                )(xp)
                y.block_until_ready()
                return y.reshape(orig_shape)
            except Exception:
                # Mosaic reshape-lowering limitation -> fall back to plain path.
                pass
        tr = _rowtile_full_lane(rows, cols, itemsize)
        kern = functools.partial(_softmax_lane_kernel, log=log)
        y = pl.pallas_call(
            kern,
            out_shape=jax.ShapeDtypeStruct((rows, cols), x.dtype),
            grid=(pl.cdiv(rows, tr),),
            in_specs=[pl.BlockSpec((tr, cols), lambda i: (i, 0))],
            out_specs=pl.BlockSpec((tr, cols), lambda i: (i, 0)),
            compiler_params=_compiler_params(("parallel",)),
        )(x2)
        return y.reshape(orig_shape)

    # channel-style reduction: keep spatial on lanes, reduce over sublanes.
    x3 = x.reshape(pre, d, post)
    tl = _lanetile_full_sublane(d, post, itemsize)
    tp = _sublane_tp(pre, d, tl, itemsize)
    kern = functools.partial(_softmax_sublane_kernel, log=log)
    y = pl.pallas_call(
        kern,
        out_shape=jax.ShapeDtypeStruct((pre, d, post), x.dtype),
        grid=(pl.cdiv(pre, tp), pl.cdiv(post, tl)),
        in_specs=[pl.BlockSpec((tp, d, tl), lambda i, j: (i, 0, j))],
        out_specs=pl.BlockSpec((tp, d, tl), lambda i, j: (i, 0, j)),
        compiler_params=_compiler_params(("parallel", "parallel")),
    )(x3)
    return y.reshape(orig_shape)


def _argmax_dim_call(x, dim):
    nd = max(x.ndim, 1)
    dim = dim % nd
    if x.ndim == 0:
        x = x.reshape(1)
    pre, d, post = _split_dims(x.shape, dim)
    out_shape = x.shape[:dim] + x.shape[dim + 1:]
    itemsize = x.dtype.itemsize

    if post == 1:
        rows, cols = pre, d
        x2 = x.reshape(rows, cols)
        g = _pack_factor(rows, cols)
        if g > 1:
            try:
                xp = x2.reshape(rows // g, g * cols)
                trp = _rowtile_full_lane(rows // g, g * cols, itemsize)
                kern = functools.partial(_argmax_lane_packed_kernel, g=g, d=cols)
                y = pl.pallas_call(
                    kern,
                    out_shape=jax.ShapeDtypeStruct((rows // g, g), jnp.int32),
                    grid=(pl.cdiv(rows // g, trp),),
                    in_specs=[pl.BlockSpec((trp, g * cols), lambda i: (i, 0))],
                    out_specs=pl.BlockSpec((trp, g), lambda i: (i, 0)),
                    compiler_params=_compiler_params(("parallel",)),
                )(xp)
                y.block_until_ready()
                return y.reshape(out_shape)
            except Exception:
                pass
        tr = _rowtile_full_lane(rows, cols, itemsize)
        y = pl.pallas_call(
            _argmax_lane_kernel,
            out_shape=jax.ShapeDtypeStruct((rows, 1), jnp.int32),
            grid=(pl.cdiv(rows, tr),),
            in_specs=[pl.BlockSpec((tr, cols), lambda i: (i, 0))],
            out_specs=pl.BlockSpec((tr, 1), lambda i: (i, 0)),
            compiler_params=_compiler_params(("parallel",)),
        )(x2)
        return y.reshape(out_shape)

    # channel argmax (argmax2d): sublane reduction, lane-dense int32 output.
    x3 = x.reshape(pre, d, post)
    tl = _lanetile_full_sublane(d, post, itemsize)
    tp = _sublane_tp(pre, d, tl, itemsize)
    y = pl.pallas_call(
        _argmax_sublane_kernel,
        out_shape=jax.ShapeDtypeStruct((pre, 1, post), jnp.int32),
        grid=(pl.cdiv(pre, tp), pl.cdiv(post, tl)),
        in_specs=[pl.BlockSpec((tp, d, tl), lambda i, j: (i, 0, j))],
        out_specs=pl.BlockSpec((tp, 1, tl), lambda i, j: (i, 0, j)),
        compiler_params=_compiler_params(("parallel", "parallel")),
    )(x3)
    return y.reshape(out_shape)


def _global_argmax_call(x):
    # TODO(synk): torch.argmax returns int64; we return int32 (TPU-native).
    rows, cols = _elementwise_2d_shape(x.shape)
    x2 = x.reshape(rows, cols)
    itemsize = x.dtype.itemsize
    # Half the usual budget: the kernel keeps several int32/f32 temporaries per
    # element live (iotas, masked copy, flat index, candidates).
    tr = _rowtile_full_lane(rows, cols, itemsize, budget=_BLOCK_BYTES // 2)
    g = -(-rows // tr)                    # number of row tiles (host int)

    # Phase 1: parallel per-tile partials (lane-dense (8,128) blocks per tile).
    kern = functools.partial(_argmax_partial_kernel, total_rows=rows)
    vals, idxs = pl.pallas_call(
        kern,
        out_shape=(jax.ShapeDtypeStruct((8 * g, 128), jnp.float32),
                   jax.ShapeDtypeStruct((8 * g, 128), jnp.int32)),
        grid=(g,),
        in_specs=[pl.BlockSpec((tr, cols), lambda i: (i, 0))],
        out_specs=(pl.BlockSpec((8, 128), lambda i: (i, 0)),
                   pl.BlockSpec((8, 128), lambda i: (i, 0))),
        compiler_params=_compiler_params(("parallel",)),
    )(x2)

    # Phase 2: tiny combine over the partial buffers.
    y = pl.pallas_call(
        _argmax_combine_kernel,
        out_shape=jax.ShapeDtypeStruct((1, 1), jnp.int32),
        grid=(1,),
        in_specs=[pl.BlockSpec((8 * g, 128), lambda i: (0, 0)),
                  pl.BlockSpec((8 * g, 128), lambda i: (0, 0))],
        out_specs=pl.BlockSpec((1, 1), lambda i: (0, 0)),
        compiler_params=_compiler_params(("arbitrary",)),
    )(vals, idxs)
    return y.reshape(())


# ----------------------------------------------------------------------------
# Activation module (JAX / Pallas port of the PyTorch dispatcher)
# ----------------------------------------------------------------------------

class Activation:
    def __init__(self, name, **params):
        self._name = name
        self._params = dict(params)
        valid = (None, "identity", "sigmoid", "clamped_sigmoid",
                 "softmax2d", "softmax", "logsoftmax", "argmax", "argmax2d")
        if callable(name):
            # TODO(synk): arbitrary user callables run as plain JAX, not Pallas.
            self._fn = name(**params)
        elif name not in valid:
            raise ValueError(
                "Activation should be callable/sigmoid/softmax/logsoftmax/"
                "None; got {}".format(name))
        else:
            self._fn = None

    @staticmethod
    def _softmax_dim(dim, ndim):
        if dim is not None:
            return dim
        # torch legacy behaviour for dim=None (F._get_softmax_dim)
        return 0 if ndim in (0, 1, 3) else 1

    def __call__(self, x):
        name, p = self._name, self._params
        if callable(name):
            return self._fn(x)
        if name is None or name == "identity":
            return x                      # nn.Identity: no kernel launch
        if name == "sigmoid":
            return _elementwise_call(x, "sigmoid")
        if name == "clamped_sigmoid":
            return _elementwise_call(x, "clamped_sigmoid",
                                     p.get("min", 0.01), p.get("max", 1.0 - 0.01))
        if name == "softmax2d":
            return _softmax_call(x, 1, log=False)
        if name == "softmax":
            return _softmax_call(x, self._softmax_dim(p.get("dim", None), x.ndim),
                                 log=False)
        if name == "logsoftmax":
            return _softmax_call(x, self._softmax_dim(p.get("dim", None), x.ndim),
                                 log=True)
        if name == "argmax":
            d = p.get("dim", None)
            return _global_argmax_call(x) if d is None else _argmax_dim_call(x, d)
        if name == "argmax2d":
            return _argmax_dim_call(x, 1)
        raise ValueError(name)


# ----------------------------------------------------------------------------
# Main: run every activation variant once and check against pure-JAX refs
# ----------------------------------------------------------------------------

if __name__ == "__main__":
    key = jax.random.PRNGKey(0)
    # NCHW, matching PyTorch conv conventions.
    x = jax.random.normal(key, (2, 4, 16, 16), dtype=jnp.float32)

    checks = []

    y = jax.block_until_ready(Activation("identity")(x))
    checks.append(bool(jnp.allclose(y, x)))

    y = jax.block_until_ready(Activation("sigmoid")(x))
    checks.append(bool(jnp.allclose(y, jax.nn.sigmoid(x), atol=1e-5)))

    y = jax.block_until_ready(Activation("clamped_sigmoid")(x))
    checks.append(bool(jnp.allclose(y, jnp.clip(jax.nn.sigmoid(x), 0.01, 0.99),
                                    atol=1e-5)))

    y = jax.block_until_ready(Activation("softmax2d")(x))
    checks.append(bool(jnp.allclose(y, jax.nn.softmax(x, axis=1), atol=1e-4)))

    y = jax.block_until_ready(Activation("softmax", dim=1)(x))
    checks.append(bool(jnp.allclose(y, jax.nn.softmax(x, axis=1), atol=1e-4)))

    y = jax.block_until_ready(Activation("softmax", dim=3)(x))
    checks.append(bool(jnp.allclose(y, jax.nn.softmax(x, axis=3), atol=1e-4)))

    y = jax.block_until_ready(Activation("logsoftmax", dim=1)(x))
    checks.append(bool(jnp.allclose(y, jax.nn.log_softmax(x, axis=1), atol=1e-5)))

    y = jax.block_until_ready(Activation("argmax2d")(x))
    checks.append(bool(jnp.array_equal(y, jnp.argmax(x, axis=1).astype(jnp.int32))))

    y = jax.block_until_ready(Activation("argmax")(x))
    checks.append(bool(jnp.array_equal(y, jnp.argmax(x).astype(jnp.int32))))

    if all(checks):
        print("KERNEL_OK")
    else:
        raise SystemExit("mismatch vs reference: {}".format(checks))
</pallas_src>

<mosaic_0001>
module attributes {stable_mosaic.version = 11 : i64} {
  func.func @_elementwise_kernel(%arg0: i32, %arg1: i32, %arg2: memref<8x256xf32, #tpu.memory_space<vmem>>, %arg3: memref<8x256xf32, #tpu.memory_space<vmem>>) attributes {dimension_semantics = [#tpu.dimension_semantics<parallel>, #tpu.dimension_semantics<parallel>], iteration_bounds = array<i64: 1, 1>, scalar_prefetch = 0 : i64, scratch_operands = 0 : i64, tpu.core_type = #tpu.core_type<tc>, window_params = [{transform_indices = @transform_0, window_bounds = array<i64: 8, 256>}, {transform_indices = @transform_1, window_bounds = array<i64: 8, 256>}]} {
    %c0 = arith.constant 0 : index
    %c0_0 = arith.constant 0 : index
    %0 = vector.load %arg2[%c0, %c0_0] : memref<8x256xf32, #tpu.memory_space<vmem>>, vector<8x256xf32>
    %1 = arith.negf %0 : vector<8x256xf32>
    %2 = math.exp %1 : vector<8x256xf32>
    %cst = arith.constant 1.000000e+00 : f32
    %3 = vector.broadcast %cst : f32 to vector<8x256xf32>
    %4 = arith.addf %3, %2 : vector<8x256xf32>
    %5 = arith.divf %3, %4 : vector<8x256xf32>
    %c0_1 = arith.constant 0 : index
    %c0_2 = arith.constant 0 : index
    %6 = vector.load %arg3[%c0_1, %c0_2] : memref<8x256xf32, #tpu.memory_space<vmem>>, vector<8x256xf32>
    tpu.vector_store %arg3[%c0_1, %c0_2], %5 {strides = array<i32>} : memref<8x256xf32, #tpu.memory_space<vmem>>, vector<8x256xf32>,
    return
  }
  func.func @transform_0(%arg0: i32, %arg1: i32) -> (i32, i32) {
    %c0_i32 = arith.constant 0 : i32
    return %arg0, %arg1 : i32, i32
  }
  func.func @transform_1(%arg0: i32, %arg1: i32) -> (i32, i32) {
    %c0_i32 = arith.constant 0 : i32
    return %arg0, %arg1 : i32, i32
  }
}

</mosaic_0001>

<bundles_post_ra>
// kernel: tpu_custom_call.1
= control target key start
LH: loop header
LB: loop body
LE: loop exit
PB: predicated region body
PF: predicated region fallthrough
CT: control target
= control target key end

     0   :  { %6 = vsyncpa [#allocation3], 0  ;;  %s164_s0 = inlined_call_operand.hbm [shape: f32[8,256], index: 0, kind: input, shape index: {}]   ;;  %s165_s1 = inlined_call_operand.hbm [shape: f32[8,256], index: 1, kind: output, shape index: {}]  }
   0x1   :  { %7 = vsyncpa [#allocation4], 0  ;;  %s13_s8 = sshll.u32 %s164_s0, 4  ;;  %s146_s9 = smov [#allocation2]   ;;  %s14_s8 = int_to_ptr.hbm [resolvable:$true] %s13_s8 }
   0x2   :  { %s15_s10 = sshll.u32 %s146_s9, 4  ;;  %s16_s10 = int_to_ptr.vmem [resolvable:$true] %s15_s10 }
   0x3   :  { %18 = dma.hbm_to_vmem [thread:$0]  %s14_s8, 256, %s16_s10, [#allocation3]  }
   0x4   :  { %142 = dma.done.wait [#allocation3], 256  }
   0x5   :  { %143 = vsyncadd [#allocation3], 4294967040  ;;  %v23_v0 = vld [vmem:[#allocation2] sm:$0xff]  ;;  %v24_v1 = vld [vmem:[#allocation2 + $0x8] sm:$0xff]  ;;  %s147_s0 = smov [#allocation5]   ;;  %s72_s14 = sshll.u32 %s165_s1, 4  ;;  %s73_s14 = int_to_ptr.hbm [resolvable:$true] %s72_s14 }
   0x6   :  { %v82_v2 = vmul.f32 -1.442695, %v23_v0  ;;  %v83_v3 = vmul.f32 -1.442695, %v24_v1  ;;  %s70_s11 = sshll.u32 %s147_s0, 4  ;;  %s71_s11 = int_to_ptr.vmem [resolvable:$true] %s70_s11 }
   0x8   :  { %86 = vpow2.f32 %v82_v2 }
   0x9   :  { %88 = vpow2.f32 %v83_v3 }
   0xe   :  { %v87_v4 = vpop.eup %86 }
   0xf   :  { %v89_v5 = vpop.eup %88  ;;  %v31_v6 = vadd.f32 1.0, %v87_v4 }
  0x10   :  { %v32_v7 = vadd.f32 1.0, %v89_v5 }
  0x11   :  { %90 = vrcp.f32 %v31_v6  ;;  %vm38_vm0 = vweird.f32 %v31_v6  ;;  %v44_v11 = vand.u32 2147483648, %v31_v6  ;;  %v42_v14 = vand.u32 2147483647, %v31_v6 }
  0x12   :  { %92 = vrcp.f32 %v32_v7  ;;  %v59_v15 = vand.u32 2147483648, %v32_v7  ;;  %vm53_vm2 = vweird.f32 %v32_v7  ;;  %v57_v17 = vand.u32 2147483647, %v32_v7 }
  0x13   :  { %v45_v19 = vor.u32 1.1754944e-38, %v44_v11  ;;  %vm43_vm5 = vcmp.eq.f32.partialorder %v42_v14, 8.507059e+37 }
  0x14   :  { %v60_v22 = vor.u32 1.1754944e-38, %v59_v15  ;;  %vm58_vm7 = vcmp.eq.f32.partialorder %v57_v17, 8.507059e+37 }
  0x17   :  { %v91_v8 = vpop.eup %90 }
  0x18   :  { %v93_v9 = vpop.eup %92  ;;  %v34_v10 = vmul.f32 %v91_v8, %v31_v6  ;;  %vm39_vm1 = vweird.f32 %v91_v8 }
  0x19   :  { %v49_v12 = vmul.f32 %v93_v9, %v32_v7  ;;  %vm54_vm3 = vweird.f32 %v93_v9  ;;  %vm40_vm4 = vmor %vm38_vm0, %vm39_vm1 }
  0x1a   :  { %v35_v13 = vsub.f32 1.0, %v34_v10  ;;  %vm55_vm6 = vmor %vm53_vm2, %vm54_vm3 }
  0x1b   :  { %v50_v16 = vsub.f32 1.0, %v49_v12 }
  0x1c   :  { %v36_v18 = vmul.f32 %v91_v8, %v35_v13 }
  0x1d   :  { %v51_v20 = vmul.f32 %v93_v9, %v50_v16 }
  0x1e   :  { %v37_v21 = vadd.f32 %v91_v8, %v36_v18 }
  0x1f   :  { %v52_v23 = vadd.f32 %v93_v9, %v51_v20 }
  0x20   :  { %v41_v24 = vsel %vm40_vm4, %v91_v8, %v37_v21 }
  0x21   :  { %v46_v25 = vsel %vm43_vm5, %v45_v19, %v41_v24  ;;  %v56_v26 = vsel %vm55_vm6, %v93_v9, %v52_v23 }
  0x22   :  { %63 = vst [vmem:[#allocation5] sm:$0xff] %v46_v25  ;;  %v61_v27 = vsel %vm58_vm7, %v60_v22, %v56_v26 }
  0x23   :  { %64 = vst [vmem:[#allocation5 + $0x8] sm:$0xff] %v61_v27 }
  0x24   :  { %75 = dma.vmem_to_hbm [thread:$0]  %s71_s11, 256, %s73_s14, [#allocation4]  }
  0x25   :  { %144 = dma.done.wait [#allocation4], 256  }
  0x26   :  { %145 = vsyncadd [#allocation4], 4294967040 }
  0x27   :  { %80 = vsyncpa [#allocation3], 1 }
  0x28   :  { %81 = vsyncpa [#allocation4], 1 }

</bundles_post_ra>
